<compile_context>
chip_gen: v7x
topology: tpu7x:2x2x1
jax: 0.10.0
libtpu: 0.0.40
codegen_flags: <defaults>
</compile_context>

<pallas_src>
import functools
import math

import jax
import jax.numpy as jnp
from jax.experimental import pallas as pl
from jax.experimental.pallas import tpu as pltpu

F32 = jnp.float32
BF16 = jnp.bfloat16
_MIB = 1024 * 1024


def _vmem():
    return pl.BlockSpec(memory_space=pltpu.MemorySpace.VMEM)


def _pick_tile(n, cap=512):
    """Largest row tile <= cap that divides n and is a multiple of 8 (else n)."""
    if n <= cap:
        return n
    t = cap - (cap % 8)
    while t >= 8:
        if n % t == 0:
            return t
        t -= 8
    return n


def _vmem_limit(need_bytes, floor_mib=16, cap_mib=48):
    """Scoped-VMEM request derived from the working set (v7x-safe cap)."""
    return int(min(max(need_bytes * 1.5, floor_mib * _MIB), cap_mib * _MIB))


# --------------------------------------------------------------------------
# fused propagate + (q | skip | k | v) projections + reassociated weighted_linear
# row-tiled over nodes; deg^-1/2 precomputed outside (no full-mask residency)
# --------------------------------------------------------------------------

def _conv_pre_kernel(xr_ref, xt_ref, aw_ref, disr_ref, disc_ref,
                     wcat_ref, bcat_ref, wlw_ref, wlb_ref, qb_ref, kv_ref, *, hd):
    # norm[i,j] = deg^-1/2[src=j] * w[i,j] * deg^-1/2[dst=i]   (matches degree(row))
    a_norm = disr_ref[...] * aw_ref[...] * disc_ref[...]              # [TM, N] f32
    # weighted_linear reassociated: (A @ x) @ Wl == A @ (x @ Wl) -> propagate
    # output is HD-wide (lane-dense) and one MXU matmul is eliminated.
    xw = jnp.dot(xr_ref[...].astype(BF16), wlw_ref[...].astype(BF16),
                 preferred_element_type=F32)                          # [N, HD]
    x_agg = jnp.dot(a_norm.astype(BF16), xw.astype(BF16),
                    preferred_element_type=F32)                       # [TM, HD]
    # fused q | skip | k | v projections for the tile rows (one MXU pass)
    proj = jnp.dot(xt_ref[...].astype(BF16), wcat_ref[...].astype(BF16),
                   preferred_element_type=F32) + bcat_ref[...]        # [TM, 4*HD]
    base = x_agg + wlb_ref[...] + proj[:, hd:2 * hd]
    qb_ref[...] = jnp.concatenate([proj[:, :hd], base], axis=1)       # [TM, 2*HD]
    kv_ref[...] = proj[:, 2 * hd:]                                    # [TM, 2*HD]


def conv_pre_pallas(x, a_w, dis_row, dis_col, wcat, bcat, wl_w, wl_b, hd):
    n, f = x.shape
    tm = _pick_tile(n)
    need = (2 * (tm * n * 4 + tm * f * 4 + 2 * tm * 2 * hd * 4)     # streamed blocks
            + n * f * 4 + n * hd * 4                                 # resident x + xw
            + tm * n * 4 + tm * 4 * hd * 4)                          # temporaries
    return pl.pallas_call(
        functools.partial(_conv_pre_kernel, hd=hd),
        out_shape=(jax.ShapeDtypeStruct((n, 2 * hd), F32),
                   jax.ShapeDtypeStruct((n, 2 * hd), F32)),
        grid=(n // tm,),
        in_specs=[
            pl.BlockSpec((n, f), lambda i: (0, 0)),        # x resident (propagate RHS)
            pl.BlockSpec((tm, f), lambda i: (i, 0)),       # x tile rows (projections)
            pl.BlockSpec((tm, n), lambda i: (i, 0)),       # A_w tile rows
            pl.BlockSpec((1, n), lambda i: (0, 0)),        # deg^-1/2 (source columns)
            pl.BlockSpec((tm, 1), lambda i: (i, 0)),       # deg^-1/2 (dest rows)
            pl.BlockSpec((f, 4 * hd), lambda i: (0, 0)),
            pl.BlockSpec((1, 4 * hd), lambda i: (0, 0)),
            pl.BlockSpec((f, hd), lambda i: (0, 0)),
            pl.BlockSpec((1, hd), lambda i: (0, 0)),
        ],
        out_specs=(pl.BlockSpec((tm, 2 * hd), lambda i: (i, 0)),
                   pl.BlockSpec((tm, 2 * hd), lambda i: (i, 0))),
        compiler_params=pltpu.CompilerParams(
            dimension_semantics=("parallel",),
            vmem_limit_bytes=_vmem_limit(need)),
    )(x, x, a_w, dis_row, dis_col, wcat, bcat, wl_w, wl_b)


# --------------------------------------------------------------------------
# TransformerConv attention (heads on lanes, raw bf16 edge attrs, row-tiled)
# per-head outputs accumulate into a [TQ, HD] VMEM scratch (no concat on store)
# --------------------------------------------------------------------------

def _attn_kernel(qb_ref, kv_ref, et_ref, mask_ref, we_ref, wet_ref, o_ref, acc_ref,
                 *, heads, d, scale, edge_feats):
    hd = heads * d
    qb = qb_ref[...]                           # [TQ, 2*HD] = q | base
    kv = kv_ref[...]                           # [N,  2*HD] = k | v
    q = qb[:, :hd]
    base = qb[:, hd:]
    mask = mask_ref[...].astype(F32)           # bf16 0/1 -> exact f32
    we = we_ref[...]                           # [E, HD]
    wet = wet_ref[...]                         # [HD, E]
    et = [et_ref[e].astype(F32) for e in range(edge_feats)]   # E x [TQ, N]
    neg = jnp.finfo(F32).min
    for h in range(heads):                     # static unroll, lane-dense [*, N]
        lo, hi = h * d, (h + 1) * d
        qh = q[:, lo:hi].astype(BF16)                          # [TQ, D]
        kh = kv[:, lo:hi].astype(BF16)                         # [N, D]
        vh = kv[:, hd + lo:hd + hi].astype(BF16)               # [N, D]
        s = jax.lax.dot_general(qh, kh, (((1,), (1,)), ((), ())),
                                preferred_element_type=F32)    # [TQ, N]
        # edge term: q_i . (Eattr_ij @ We_h) == (q_i @ We_h^T) . Eattr_ij
        qe = jnp.dot(qh, wet[lo:hi, :].astype(BF16),
                     preferred_element_type=F32)               # [TQ, E]
        for e in range(edge_feats):
            s = s + qe[:, e:e + 1] * et[e]
        s = s * scale
        s = jnp.where(mask > 0, s, neg)
        m = jnp.max(s, axis=-1, keepdims=True)
        p = jnp.exp(s - m) * mask
        denom = jnp.sum(p, axis=-1, keepdims=True)
        inv = pl.reciprocal(jnp.where(denom > 0, denom, 1.0), approx=True)
        alpha = p * inv                                        # softmax over in-edges
        out_h = jnp.dot(alpha.astype(BF16), vh, preferred_element_type=F32)
        # sum_j alpha_ij * e_ij == (sum_j alpha_ij * Eattr_ij) @ We_h
        ae = jnp.concatenate(
            [jnp.sum(alpha * et[e], axis=-1, keepdims=True)
             for e in range(edge_feats)], axis=1)              # [TQ, E]
        out_h = out_h + jnp.dot(ae.astype(BF16), we[:, lo:hi].astype(BF16),
                                preferred_element_type=F32)
        acc_ref[:, lo:hi] = out_h                              # lane-slice scratch write
    o_ref[...] = base + acc_ref[...]                           # single dense store


def _attn_tq_and_vmem(n, hd, e):
    def need(tq):
        stream = tq * n * 2 * (e + 1) + tq * 2 * hd * 4 + tq * hd * 4   # bf16 slabs + io
        resident = n * 2 * hd * 4 + tq * hd * 4                          # kv + scratch
        temps = (e + 6) * tq * n * 4                                     # f32 temporaries
        return 2 * stream + resident + temps
    tq = _pick_tile(n)
    while tq > 8 and need(tq) > 24 * _MIB:
        t = tq - 8
        while t >= 8 and n % t:
            t -= 8
        if t < 8:
            break
        tq = t
    return tq, _vmem_limit(need(tq))


def attention_pallas(qb, kv, eattr_t, mask, we, we_t, heads, d):
    n = kv.shape[0]
    hd = heads * d
    e = eattr_t.shape[0]
    tq, vlim = _attn_tq_and_vmem(n, hd, e)
    return pl.pallas_call(
        functools.partial(_attn_kernel, heads=heads, d=d,
                          scale=1.0 / math.sqrt(d), edge_feats=e),
        out_shape=jax.ShapeDtypeStruct((n, hd), F32),
        grid=(n // tq,),
        in_specs=[
            pl.BlockSpec((tq, 2 * hd), lambda i: (i, 0)),    # q | base   (query rows)
            pl.BlockSpec((n, 2 * hd), lambda i: (0, 0)),     # k | v      (resident)
            pl.BlockSpec((e, tq, n), lambda i: (0, i, 0)),   # raw Eattr  (bf16 stream)
            pl.BlockSpec((tq, n), lambda i: (i, 0)),         # mask       (bf16 stream)
            pl.BlockSpec((e, hd), lambda i: (0, 0)),         # W_edge
            pl.BlockSpec((hd, e), lambda i: (0, 0)),         # W_edge^T
        ],
        out_specs=pl.BlockSpec((tq, hd), lambda i: (i, 0)),
        scratch_shapes=[pltpu.VMEM((tq, hd), F32)],
        compiler_params=pltpu.CompilerParams(
            dimension_semantics=("parallel",),
            vmem_limit_bytes=vlim),
    )(qb, kv, eattr_t, mask, we, we_t)


# --------------------------------------------------------------------------
# fused Linear + ReLU + BatchNorm (train-mode batch stats) + TopK tanh score
# --------------------------------------------------------------------------

def _transf_bn_score_kernel(x_ref, w_ref, b_ref, g_ref, beta_ref, p_ref,
                            o_ref, s_ref, *, eps):
    y = jnp.dot(x_ref[...].astype(BF16), w_ref[...].astype(BF16),
                preferred_element_type=F32) + b_ref[...]
    y = jnp.maximum(y, 0.0)                                           # ReLU
    mean = jnp.mean(y, axis=0, keepdims=True)
    var = jnp.mean((y - mean) ** 2, axis=0, keepdims=True)            # biased (BN train)
    ybn = (y - mean) * jax.lax.rsqrt(var + eps) * g_ref[...] + beta_ref[...]
    o_ref[...] = ybn
    # TopKPooling score while ybn is already in VMEM: tanh(x.p / ||p||)
    p = p_ref[...]                                                    # [F, 1]
    nrm = jnp.maximum(jnp.sqrt(jnp.sum(p * p, keepdims=True)), 1e-12)
    s_ref[...] = jnp.tanh(jnp.dot(ybn, p, preferred_element_type=F32) / nrm)


def transf_bn_score_pallas(x, w, b, gamma, beta, p, eps=1e-5):
    n, fout = x.shape[0], w.shape[1]
    return pl.pallas_call(
        functools.partial(_transf_bn_score_kernel, eps=eps),
        out_shape=(jax.ShapeDtypeStruct((n, fout), F32),
                   jax.ShapeDtypeStruct((n, 1), F32)),
        in_specs=[_vmem()] * 6,
        out_specs=(_vmem(), _vmem()),
    )(x, w, b, gamma, beta, p)


# --------------------------------------------------------------------------
# TopK pooling: one-hot permutation applied as bf16 MXU matmuls, with the
# global max+mean pooling fused into the epilogue
# --------------------------------------------------------------------------

def _topk_apply_kernel(p_ref, x_ref, g_ref, aw_ref, m_ref, et_ref,
                       xo_ref, awo_ref, mo_ref, eto_ref, pool_ref,
                       *, edge_feats, k, num_graphs):
    Pb = p_ref[...].astype(BF16)                  # one-hot permutation: exact in bf16
    Ptb = jnp.transpose(Pb)
    x_new = (jnp.dot(Pb, x_ref[...].astype(BF16), preferred_element_type=F32)
             * jnp.dot(Pb, g_ref[...].astype(BF16), preferred_element_type=F32))  # gate
    xo_ref[...] = x_new
    aw_l = jnp.dot(Pb, aw_ref[...].astype(BF16), preferred_element_type=F32)
    awo_ref[...] = jnp.dot(aw_l.astype(BF16), Ptb, preferred_element_type=F32)
    m_l = jnp.dot(Pb, m_ref[...], preferred_element_type=F32)          # mask is bf16
    mo_ref[...] = jnp.dot(m_l.astype(BF16), Ptb,
                          preferred_element_type=F32).astype(BF16)
    for e in range(edge_feats):
        e_l = jnp.dot(Pb, et_ref[e], preferred_element_type=F32)       # eattr is bf16
        eto_ref[e] = jnp.dot(e_l.astype(BF16), Ptb,
                             preferred_element_type=F32).astype(BF16)
    # fused global max + mean pooling over the contiguous k-node graphs
    rows = []
    for gi in range(num_graphs):
        chunk = x_new[gi * k:(gi + 1) * k, :]
        rows.append(jnp.concatenate(
            [jnp.max(chunk, axis=0, keepdims=True),
             jnp.mean(chunk, axis=0, keepdims=True)], axis=1))
    pool_ref[...] = jnp.concatenate(rows, axis=0)                       # [G, 2F]


def topk_pool(x, gate, a_w, mask, eattr_t, num_graphs, npg, ratio):
    n, f = x.shape
    e = eattr_t.shape[0]
    k = int(math.ceil(ratio * npg))
    per_graph = gate[:, 0].reshape(num_graphs, npg)
    _, idx = jax.lax.top_k(per_graph, k)                                # per-graph top-k
    perm = (idx + (jnp.arange(num_graphs) * npg)[:, None]).reshape(-1)
    P = jax.nn.one_hot(perm, n, dtype=F32)                              # [G*k, N]
    kt = num_graphs * k
    x_new, a_w_new, mask_new, eattr_new, pooled = pl.pallas_call(
        functools.partial(_topk_apply_kernel, edge_feats=e, k=k,
                          num_graphs=num_graphs),
        out_shape=(jax.ShapeDtypeStruct((kt, f), F32),
                   jax.ShapeDtypeStruct((kt, kt), F32),
                   jax.ShapeDtypeStruct((kt, kt), BF16),
                   jax.ShapeDtypeStruct((e, kt, kt), BF16),
                   jax.ShapeDtypeStruct((num_graphs, 2 * f), F32)),
        in_specs=[_vmem()] * 6,
        out_specs=(_vmem(),) * 5,
    )(P, x, gate, a_w, mask, eattr_t)
    return x_new, a_w_new, mask_new, eattr_new, pooled, k


# ----------------------------- module glue ---------------------------------

def custom_transformer_conv(x, a_w, mask, eattr_t, prm, heads, out_ch):
    """CustomTransformerConv.forward (degree-norm propagate + TransformerConv)."""
    hd = heads * out_ch
    # degree(row) = out-degree of source nodes (column sums of mask[dst, src])
    deg = jnp.sum(mask.astype(F32), axis=0, keepdims=True)              # [1, N]
    dis_row = jnp.where(deg > 0, jax.lax.rsqrt(deg), 0.0)               # guarded deg^-0.5
    dis_col = jnp.transpose(dis_row)                                    # [N, 1]
    qb, kv = conv_pre_pallas(x, a_w, dis_row, dis_col, prm["wcat"], prm["bcat"],
                             prm["wl_w"], prm["wl_b"], hd)
    return attention_pallas(qb, kv, eattr_t, mask, prm["edge_w"], prm["edge_w_t"],
                            heads, out_ch)


def graph_encoder_forward(params, x, eattr_t, a_w, mask, num_graphs, npg, emb, heads,
                          num_layers=3, top_k_every_n=3, ratio=0.5):
    x = custom_transformer_conv(x, a_w, mask, eattr_t, params["conv1"], heads, emb)
    x, _ = transf_bn_score_pallas(x, params["transf1_w"], params["transf1_b"],
                                  params["bn1_g"], params["bn1_b"],
                                  params["pool_p"][0])                  # score unused
    global_rep = []
    for i in range(num_layers):
        x = custom_transformer_conv(x, a_w, mask, eattr_t, params["convs"][i],
                                    heads, emb)
        x, gate = transf_bn_score_pallas(x, params["transf_w"][i], params["transf_b"][i],
                                         params["bn_g"][i], params["bn_b"][i],
                                         params["pool_p"][i])
        if i % top_k_every_n == 0 or i == num_layers - 1:
            x, a_w, mask, eattr_t, pooled, npg = topk_pool(
                x, gate, a_w, mask, eattr_t, num_graphs, npg, ratio)
            global_rep.append(pooled)                                   # cat([gmp,gap],1)
    return sum(global_rep)                                              # [G, 2*emb]


def improvement_prediction_forward(params, x, edge_attr, edge_index, edge_weight,
                                   batch_index, num_graphs, npg, emb, heads, edge_feats):
    del batch_index  # encoded by the contiguous equal-size graph blocks (npg)
    n = x.shape[0]
    src, dst = edge_index[0], edge_index[1]
    a_w = jnp.zeros((n, n), F32).at[dst, src].add(edge_weight)
    mask = jnp.zeros((n, n), F32).at[dst, src].set(1.0).astype(BF16)     # 0/1 exact
    # scatter directly into the transposed [E, N, N] layout; stream as bf16
    eattr_t = (jnp.zeros((edge_feats, n, n), F32)
               .at[:, dst, src].add(jnp.transpose(edge_attr))).astype(BF16)
    graph_embedding = graph_encoder_forward(params, x, eattr_t, a_w, mask,
                                            num_graphs, npg, emb, heads)
    # TODO(synk): DeepGPModel / GaussianLikelihood (gpytorch) head not translatable.
    return graph_embedding


# ----------------------------- parameter init ------------------------------

def init_linear_params(key, fin, fout, bias=True):
    kw, kb = jax.random.split(key)
    w = jax.random.normal(kw, (fin, fout), F32) / math.sqrt(fin)
    b = (jax.random.normal(kb, (1, fout), F32) * 0.01
         if bias else jnp.zeros((1, fout), F32))
    return w, b


def init_conv_params(key, fin, emb, heads, edge_feats):
    ks = jax.random.split(key, 3)
    hd = emb * heads
    wcat, bcat = init_linear_params(ks[0], fin, 4 * hd)              # q | skip | k | v
    wl_w, wl_b = init_linear_params(ks[1], fin, hd)                  # weighted_linear
    edge_w, _ = init_linear_params(ks[2], edge_feats, hd, bias=False)
    return {"wcat": wcat, "bcat": bcat, "wl_w": wl_w, "wl_b": wl_b,
            "edge_w": edge_w, "edge_w_t": jnp.transpose(edge_w)}


def init_model_params(key, in_feats, edge_feats, emb, heads=4, num_layers=3):
    keys = jax.random.split(key, 2 + num_layers)
    params = {
        "conv1": init_conv_params(keys[0], in_feats, emb, heads, edge_feats),
        "bn1_g": jnp.ones((1, emb), F32), "bn1_b": jnp.zeros((1, emb), F32),
        "convs": [], "transf_w": [], "transf_b": [],
        "bn_g": [], "bn_b": [], "pool_p": [],
    }
    params["transf1_w"], params["transf1_b"] = init_linear_params(keys[1], emb * heads, emb)
    for i in range(num_layers):
        k0, k1, k2 = jax.random.split(keys[2 + i], 3)
        params["convs"].append(init_conv_params(k0, emb, emb, heads, edge_feats))
        tw, tb = init_linear_params(k1, emb * heads, emb)
        params["transf_w"].append(tw)
        params["transf_b"].append(tb)
        params["bn_g"].append(jnp.ones((1, emb), F32))
        params["bn_b"].append(jnp.zeros((1, emb), F32))
        params["pool_p"].append(jax.random.normal(k2, (emb, 1), F32) / math.sqrt(emb))
    return params


# ----------------------------- demo / smoke test ---------------------------

if __name__ == "__main__":
    in_feats, edge_feats, emb, heads = 8, 4, 8, 4
    num_graphs, npg = 2, 8
    n = num_graphs * npg

    key = jax.random.PRNGKey(0)
    k_params, k_x, k_ea, k_ew = jax.random.split(key, 4)
    params = init_model_params(k_params, in_feats, edge_feats, emb, heads)

    # two disjoint 8-node graphs: directed ring + skip-2 ring (every node has in/out edges)
    src_l, dst_l = [], []
    for g in range(num_graphs):
        base = g * npg
        for i in range(npg):
            src_l += [base + i, base + i]
            dst_l += [base + (i + 1) % npg, base + (i + 2) % npg]
    edge_index = jnp.array([src_l, dst_l], jnp.int32)
    num_edges = edge_index.shape[1]

    x = jax.random.normal(k_x, (n, in_feats), F32)
    edge_attr = jax.random.normal(k_ea, (num_edges, edge_feats), F32)
    edge_weight = jax.random.uniform(k_ew, (num_edges,), F32, 0.5, 1.5)
    batch_index = jnp.repeat(jnp.arange(num_graphs, dtype=jnp.int32), npg)

    out = improvement_prediction_forward(
        params, x, edge_attr, edge_index, edge_weight, batch_index,
        num_graphs, npg, emb, heads, edge_feats)
    out = jax.block_until_ready(out)

    assert out.shape == (num_graphs, 2 * emb), out.shape
    assert bool(jnp.all(jnp.isfinite(out)))
    print("KERNEL_OK")
</pallas_src>

<mosaic_0001>
module attributes {stable_mosaic.version = 11 : i64} {
  func.func @_conv_pre_kernel(%arg0: i32, %arg1: memref<16x8xf32, #tpu.memory_space<vmem>>, %arg2: memref<16x8xf32, #tpu.memory_space<vmem>>, %arg3: memref<16x16xf32, #tpu.memory_space<vmem>>, %arg4: memref<1x16xf32, #tpu.memory_space<vmem>>, %arg5: memref<16x1xf32, #tpu.memory_space<vmem>>, %arg6: memref<8x128xf32, #tpu.memory_space<vmem>>, %arg7: memref<1x128xf32, #tpu.memory_space<vmem>>, %arg8: memref<8x32xf32, #tpu.memory_space<vmem>>, %arg9: memref<1x32xf32, #tpu.memory_space<vmem>>, %arg10: memref<16x64xf32, #tpu.memory_space<vmem>>, %arg11: memref<16x64xf32, #tpu.memory_space<vmem>>) attributes {dimension_semantics = [#tpu.dimension_semantics<parallel>], iteration_bounds = array<i64: 1>, scalar_prefetch = 0 : i64, scratch_operands = 0 : i64, tpu.core_type = #tpu.core_type<tc>, window_params = [{pipeline_mode = #tpu.pipeline_mode<synchronous>, transform_indices = @transform_0, window_bounds = array<i64: 16, 8>}, {transform_indices = @transform_1, window_bounds = array<i64: 16, 8>}, {transform_indices = @transform_2, window_bounds = array<i64: 16, 16>}, {pipeline_mode = #tpu.pipeline_mode<synchronous>, transform_indices = @transform_3, window_bounds = array<i64: 1, 16>}, {transform_indices = @transform_4, window_bounds = array<i64: 16, 1>}, {pipeline_mode = #tpu.pipeline_mode<synchronous>, transform_indices = @transform_5, window_bounds = array<i64: 8, 128>}, {pipeline_mode = #tpu.pipeline_mode<synchronous>, transform_indices = @transform_6, window_bounds = array<i64: 1, 128>}, {pipeline_mode = #tpu.pipeline_mode<synchronous>, transform_indices = @transform_7, window_bounds = array<i64: 8, 32>}, {pipeline_mode = #tpu.pipeline_mode<synchronous>, transform_indices = @transform_8, window_bounds = array<i64: 1, 32>}, {transform_indices = @transform_9, window_bounds = array<i64: 16, 64>}, {transform_indices = @transform_10, window_bounds = array<i64: 16, 64>}]} {
    %c0 = arith.constant 0 : index
    %c0_0 = arith.constant 0 : index
    %0 = vector.load %arg4[%c0, %c0_0] : memref<1x16xf32, #tpu.memory_space<vmem>>, vector<1x16xf32>
    %c0_1 = arith.constant 0 : index
    %c0_2 = arith.constant 0 : index
    %1 = vector.load %arg3[%c0_1, %c0_2] : memref<16x16xf32, #tpu.memory_space<vmem>>, vector<16x16xf32>
    %2 = vector.broadcast %0 : vector<1x16xf32> to vector<16x16xf32>
    %3 = arith.mulf %2, %1 : vector<16x16xf32>
    %c0_3 = arith.constant 0 : index
    %c0_4 = arith.constant 0 : index
    %4 = vector.load %arg5[%c0_3, %c0_4] : memref<16x1xf32, #tpu.memory_space<vmem>>, vector<16x1xf32>
    %5 = vector.broadcast %4 : vector<16x1xf32> to vector<16x16xf32>
    %6 = arith.mulf %3, %5 : vector<16x16xf32>
    %c0_5 = arith.constant 0 : index
    %c0_6 = arith.constant 0 : index
    %7 = vector.load %arg1[%c0_5, %c0_6] : memref<16x8xf32, #tpu.memory_space<vmem>>, vector<16x8xf32>
    %8 = arith.truncf %7 : vector<16x8xf32> to vector<16x8xbf16>
    %c0_7 = arith.constant 0 : index
    %c0_8 = arith.constant 0 : index
    %9 = vector.load %arg8[%c0_7, %c0_8] : memref<8x32xf32, #tpu.memory_space<vmem>>, vector<8x32xf32>
    %10 = arith.truncf %9 : vector<8x32xf32> to vector<8x32xbf16>
    %cst = arith.constant dense<0.000000e+00> : vector<16x32xf32>
    %11 = tpu.matmul %8, %10, %cst {dimension_numbers = #tpu.dot_dimension_numbers<[1], [0], [0], [1], [0, 0, 1, 1], [], []>} : vector<16x8xbf16>, vector<8x32xbf16>, vector<16x32xf32> -> vector<16x32xf32>
    %12 = arith.truncf %6 : vector<16x16xf32> to vector<16x16xbf16>
    %13 = arith.truncf %11 : vector<16x32xf32> to vector<16x32xbf16>
    %cst_9 = arith.constant dense<0.000000e+00> : vector<16x32xf32>
    %14 = tpu.matmul %12, %13, %cst_9 {dimension_numbers = #tpu.dot_dimension_numbers<[1], [0], [0], [1], [0, 0, 1, 1], [], []>} : vector<16x16xbf16>, vector<16x32xbf16>, vector<16x32xf32> -> vector<16x32xf32>
    %c0_10 = arith.constant 0 : index
    %c0_11 = arith.constant 0 : index
    %15 = vector.load %arg2[%c0_10, %c0_11] : memref<16x8xf32, #tpu.memory_space<vmem>>, vector<16x8xf32>
    %16 = arith.truncf %15 : vector<16x8xf32> to vector<16x8xbf16>
    %c0_12 = arith.constant 0 : index
    %c0_13 = arith.constant 0 : index
    %17 = vector.load %arg6[%c0_12, %c0_13] : memref<8x128xf32, #tpu.memory_space<vmem>>, vector<8x128xf32>
    %18 = arith.truncf %17 : vector<8x128xf32> to vector<8x128xbf16>
    %cst_14 = arith.constant dense<0.000000e+00> : vector<16x128xf32>
    %19 = tpu.matmul %16, %18, %cst_14 {dimension_numbers = #tpu.dot_dimension_numbers<[1], [0], [0], [1], [0, 0, 1, 1], [], []>} : vector<16x8xbf16>, vector<8x128xbf16>, vector<16x128xf32> -> vector<16x128xf32>
    %c0_15 = arith.constant 0 : index
    %c0_16 = arith.constant 0 : index
    %20 = vector.load %arg7[%c0_15, %c0_16] : memref<1x128xf32, #tpu.memory_space<vmem>>, vector<1x128xf32>
    %21 = vector.broadcast %20 : vector<1x128xf32> to vector<16x128xf32>
    %22 = arith.addf %19, %21 : vector<16x128xf32>
    %c0_17 = arith.constant 0 : index
    %c0_18 = arith.constant 0 : index
    %23 = vector.load %arg9[%c0_17, %c0_18] : memref<1x32xf32, #tpu.memory_space<vmem>>, vector<1x32xf32>
    %24 = vector.broadcast %23 : vector<1x32xf32> to vector<16x32xf32>
    %25 = arith.addf %14, %24 : vector<16x32xf32>
    %26 = vector.extract_strided_slice %22 {offsets = [0, 32], sizes = [16, 32], strides = [1, 1]} : vector<16x128xf32> to vector<16x32xf32>
    %27 = arith.addf %25, %26 : vector<16x32xf32>
    %28 = vector.extract_strided_slice %22 {offsets = [0, 0], sizes = [16, 32], strides = [1, 1]} : vector<16x128xf32> to vector<16x32xf32>
    %29 = tpu.concatenate %28, %27 in 1 : vector<16x32xf32>, vector<16x32xf32> -> vector<16x64xf32>
    %c0_19 = arith.constant 0 : index
    %c0_20 = arith.constant 0 : index
    %30 = vector.load %arg10[%c0_19, %c0_20] : memref<16x64xf32, #tpu.memory_space<vmem>>, vector<16x64xf32>
    tpu.vector_store %arg10[%c0_19, %c0_20], %29 {strides = array<i32>} : memref<16x64xf32, #tpu.memory_space<vmem>>, vector<16x64xf32>,
    %31 = vector.extract_strided_slice %22 {offsets = [0, 64], sizes = [16, 64], strides = [1, 1]} : vector<16x128xf32> to vector<16x64xf32>
    %c0_21 = arith.constant 0 : index
    %c0_22 = arith.constant 0 : index
    %32 = vector.load %arg11[%c0_21, %c0_22] : memref<16x64xf32, #tpu.memory_space<vmem>>, vector<16x64xf32>
    tpu.vector_store %arg11[%c0_21, %c0_22], %31 {strides = array<i32>} : memref<16x64xf32, #tpu.memory_space<vmem>>, vector<16x64xf32>,
    return
  }
  func.func @transform_0(%arg0: i32) -> (i32, i32) {
    %c0_i32 = arith.constant 0 : i32
    %c0_i32_0 = arith.constant 0 : i32
    %c0_i32_1 = arith.constant 0 : i32
    return %c0_i32, %c0_i32_0 : i32, i32
  }
  func.func @transform_1(%arg0: i32) -> (i32, i32) {
    %c0_i32 = arith.constant 0 : i32
    %c0_i32_0 = arith.constant 0 : i32
    return %arg0, %c0_i32 : i32, i32
  }
  func.func @transform_2(%arg0: i32) -> (i32, i32) {
    %c0_i32 = arith.constant 0 : i32
    %c0_i32_0 = arith.constant 0 : i32
    return %arg0, %c0_i32 : i32, i32
  }
  func.func @transform_3(%arg0: i32) -> (i32, i32) {
    %c0_i32 = arith.constant 0 : i32
    %c0_i32_0 = arith.constant 0 : i32
    %c0_i32_1 = arith.constant 0 : i32
    return %c0_i32, %c0_i32_0 : i32, i32
  }
  func.func @transform_4(%arg0: i32) -> (i32, i32) {
    %c0_i32 = arith.constant 0 : i32
    %c0_i32_0 = arith.constant 0 : i32
    return %arg0, %c0_i32 : i32, i32
  }
  func.func @transform_5(%arg0: i32) -> (i32, i32) {
    %c0_i32 = arith.constant 0 : i32
    %c0_i32_0 = arith.constant 0 : i32
    %c0_i32_1 = arith.constant 0 : i32
    return %c0_i32, %c0_i32_0 : i32, i32
  }
  func.func @transform_6(%arg0: i32) -> (i32, i32) {
    %c0_i32 = arith.constant 0 : i32
    %c0_i32_0 = arith.constant 0 : i32
    %c0_i32_1 = arith.constant 0 : i32
    return %c0_i32, %c0_i32_0 : i32, i32
  }
  func.func @transform_7(%arg0: i32) -> (i32, i32) {
    %c0_i32 = arith.constant 0 : i32
    %c0_i32_0 = arith.constant 0 : i32
    %c0_i32_1 = arith.constant 0 : i32
    return %c0_i32, %c0_i32_0 : i32, i32
  }
  func.func @transform_8(%arg0: i32) -> (i32, i32) {
    %c0_i32 = arith.constant 0 : i32
    %c0_i32_0 = arith.constant 0 : i32
    %c0_i32_1 = arith.constant 0 : i32
    return %c0_i32, %c0_i32_0 : i32, i32
  }
  func.func @transform_9(%arg0: i32) -> (i32, i32) {
    %c0_i32 = arith.constant 0 : i32
    %c0_i32_0 = arith.constant 0 : i32
    return %arg0, %c0_i32 : i32, i32
  }
  func.func @transform_10(%arg0: i32) -> (i32, i32) {
    %c0_i32 = arith.constant 0 : i32
    %c0_i32_0 = arith.constant 0 : i32
    return %arg0, %c0_i32 : i32, i32
  }
}

</mosaic_0001>

<bundles_post_ra>
// kernel: tpu_custom_call.1
= control target key start
LH: loop header
LB: loop body
LE: loop exit
PB: predicated region body
PF: predicated region fallthrough
CT: control target
= control target key end

     0   :  { %16 = vsyncpa [#allocation3], 0  ;;  %vm71_vm0 = vcmask 1043456   ;;  %v382_v3 = vmov 0.0   ;;  %vm383_vm1 = vmmov 0   ;;  %v384_v7 = vmov 0   ;;  %s526_s0 = inlined_call_operand.vmem [shape: f32[16,8], index: 0, kind: input, shape index: {}]   ;;  %s527_s1 = inlined_call_operand.vmem [shape: f32[16,8], index: 1, kind: input, shape index: {}]   ;;  %s528_s2 = inlined_call_operand.vmem [shape: f32[16,16], index: 2, kind: input, shape index: {}]   ;;  %s529_s3 = inlined_call_operand.vmem [shape: f32[1,16], index: 3, kind: input, shape index: {}]   ;;  %s530_s4 = inlined_call_operand.vmem [shape: f32[16,1], index: 4, kind: input, shape index: {}]   ;;  %s531_s5 = inlined_call_operand.vmem [shape: f32[8,128], index: 5, kind: input, shape index: {}]   ;;  %s532_s6 = inlined_call_operand.vmem [shape: f32[1,128], index: 6, kind: input, shape index: {}]   ;;  %s533_s7 = inlined_call_operand.vmem [shape: f32[8,32], index: 7, kind: input, shape index: {}]   ;;  %s534_s8 = inlined_call_operand.vmem [shape: f32[1,32], index: 8, kind: input, shape index: {}]   ;;  %s535_s9 = inlined_call_operand.hbm [shape: f32[16,64], index: 9, kind: output, shape index: {0}]   ;;  %s536_s10 = inlined_call_operand.hbm [shape: f32[16,64], index: 10, kind: output, shape index: {1}]  }
   0x1   :  { %v65_v0 = vld [vmem:[%s533_s7] sm:$0xff]  ;;  %v63_v2 = vld [vmem:[%s526_s0 + $0x8] sm:$0xff]  ;;  %305 = vmatprep.subr.bf16.mxu0 %v382_v3  ;;  %307 = vmatprep.mubr.msk.bf16.mxu0 %vm383_vm1, %v382_v3 }
   0x2   :  { %v62_v1 = vld [vmem:[%s526_s0] sm:$0xff]  ;;  %v66_v4 = vpack.c.bf16 %v65_v0, %v65_v0  ;;  %333 = vset.pattern.permute.xlu0 %v384_v7  ;;  %311 = vmatprep.subr.bf16.mxu1 %v382_v3  ;;  %v119_v10 = vld [vmem:[%s527_s1 + $0x8] sm:$0xff] }
   0x3   :  { %v48_v5 = vld [vmem:[%s530_s4] sm:$0xff]  ;;  %v64_v12 = vpack.c.bf16 %v63_v2, %v62_v1  ;;  %313 = vmatprep.mubr.msk.bf16.mxu1 %vm383_vm1, %v382_v3 }
   0x4   :  { %v121_v6 = vld [vmem:[%s531_s5] sm:$0xff]  ;;  %v73_v11 = vsel %vm71_vm0, %v66_v4, 0  ;;  %52 = vperm.xlu0 %333, %v48_v5  }
   0x5   :  { %v122_v8 = vpack.c.bf16 %v121_v6, %v121_v6  ;;  %v118_v9 = vld [vmem:[%s527_s1] sm:$0xff] }
   0x6   :  { %17 = vsyncpa [#allocation5], 0  ;;  %306 = vmatpush3.bf16.msra.mxu0 %v73_v11  ;;  %vm67_vm2 = vcmask 64512   ;;  %v49_v13 = vld [vmem:[%s530_s4 + $0x8] sm:$0xff]  ;;  %v120_v15 = vpack.c.bf16 %v119_v10, %v118_v9  ;;  %v293_v17 = vld [vmem:[%s529_s3] ss:$0 sm:$0xff] }
   0x7   :  { %v134_v14 = vsel %vm71_vm0, %v122_v8, 0  ;;  %317 = vmatprep.subr.bf16.mxu0 %v382_v3  ;;  %v38_v18 = vld [vmem:[%s528_s2] sm:$0xff]  ;;  %v39_v19 = vld [vmem:[%s528_s2 + $0x8] sm:$0xff]  ;;  %s385_s3 = smov 96   ;;  %vm184_vm3 = vcmask 130048   ;;  %s386_s12 = smov 32  }
   0x8   :  { %312 = vmatpush3.bf16.msra.mxu1 %v134_v14  ;;  %57 = vperm.xlu0 %333, %v49_v13   ;;  %v46_v20 = vmul.f32 %v293_v17, %v38_v18  ;;  %v47_v21 = vmul.f32 %v293_v17, %v39_v19  ;;  %v295_v23 = vld [vmem:[%s532_s6] ss:$0 sm:$0xff]  ;;  %s387_s13 = smov 64   ;;  %vm247_vm4 = vcmask 261120   ;;  %s388_s14 = smov [#allocation2]   ;;  %vm250_vm5 = vcmask 523264  }
   0x9   :  { %308 = vmatmul.mubr.msk.bf16.vlgmr.msra.gmra.mrb[0].mxu0 %vm67_vm2, %v64_v12  ;;  %v297_v39 = vld [vmem:[%s534_s8] ss:$0 sm:$0xff]  ;;  %s266_s15 = sshll.u32 %s388_s14, 4  ;;  %s389_s8 = smov [#allocation4]   ;;  %s267_s15 = int_to_ptr.vmem [resolvable:$true] %s266_s15 }
   0xa   :  { %319 = vmatprep.mubr.msk.bf16.mxu0 %vm383_vm1, %v382_v3  ;;  %s278_s16 = sshll.u32 %s389_s8, 4  ;;  %s334_s17 = scalar_lea.vmem %s267_s15, 256  ;;  %s493_s16 = int_to_ptr.vmem [resolvable:$true] %s278_s16 }
   0xb   :  { %314 = vmatmul.mubr.msk.bf16.vlgmr.msra.gmra.mrb[0].mxu1 %vm67_vm2, %v120_v15  ;;  %p335_p0 = scmp.ne.s32.totalorder %s267_s15, %s334_s17  ;;  %p339_p1 = scmp.lt.s32.totalorder %s267_s15, %s267_s15 }
   0xc   :  { %p340_p2 = scmp.lt.s32.totalorder %s334_s17, %s334_s17 }
   0xe   :  { %p341_p3 = por %p340_p2, %p339_p1 }
  0x10   :  { %p342_p4 = pnand %p341_p3, %p335_p0 }
  0x83   :  { %v53_v16 = vpop.permute.xlu0 %52 }
  0x84   :  { %v60_v27 = vmul.f32 %v53_v16, %v46_v20 }
  0x87   :  { %v58_v22 = vpop.permute.xlu0 %57 }
  0x88   :  { %v61_v29 = vmul.f32 %v58_v22, %v47_v21 }
  0x8a   :  { %v116_v37 = vpack.c.bf16 %v61_v29, %v60_v27 }
  0xdc   :  { %v109_v24 = vpop.f32.mrb[0].mxu0 }
  0xdd   :  { %v309_v25 = vpop.f32.mrb[1].mxu0 }
  0xde   :  { %v170_v26 = vpop.f32.mrb[0].mxu1  ;;  %v112_v28 = vpop.f32.mrb[2].mxu0 }
  0xdf   :  { %v171_v30 = vadd.f32 %v295_v23, %v170_v26  ;;  %v315_v31 = vpop.f32.mrb[1].mxu1  ;;  %v117_v32 = vpack.c.bf16 %v112_v28, %v109_v24  ;;  %v310_v33 = vpop.f32.mrb[3].mxu0 }
  0xe0   :  { %v173_v34 = vpop.f32.mrb[2].mxu1 }
  0xe1   :  { %231 = vrot.lane.b32.xlu1 %v171_v30, %s385_s3  ;;  %v174_v35 = vadd.f32 %v295_v23, %v173_v34  ;;  %v316_v36 = vpop.f32.mrb[3].mxu1  ;;  %318 = vmatpush3.bf16.msra.mxu0 %v117_v32 }
  0xe4   :  { %320 = vmatmul.mubr.msk.bf16.vlgmr.msra.gmra.mrb[4].mxu0 %vm184_vm3, %v116_v37 }
  0xe5   :  { %233 = vrot.lane.b32.xlu1 %v174_v35, %s385_s3 }
 0x153   :  { %v232_v38 = vpop.permute.xlu1 %231 }
 0x157   :  { %v234_v47 = vpop.permute.xlu1 %233 }
 0x1b7   :  { %v222_v40 = vpop.f32.mrb[4].mxu0 }
 0x1b8   :  { %v223_v41 = vadd.f32 %v297_v39, %v222_v40  ;;  %v321_v42 = vpop.f32.mrb[5].mxu0 }
 0x1b9   :  { %v225_v43 = vpop.f32.mrb[6].mxu0 }
 0x1ba   :  { %v237_v44 = vadd.f32 %v232_v38, %v223_v41  ;;  %v226_v45 = vadd.f32 %v297_v39, %v225_v43  ;;  %v322_v46 = vpop.f32.mrb[7].mxu0 }
 0x1bc   :  { %v238_v48 = vadd.f32 %v234_v47, %v226_v45  ;;  %241 = vrot.lane.b32.xlu0 %v237_v44, %s386_s12 }
 0x1be   :  { %243 = vrot.lane.b32.xlu1 %v238_v48, %s386_s12 }
 0x1c0   :  { %253 = vrot.lane.b32.xlu0 %v171_v30, %s387_s13 }
 0x1c2   :  { %255 = vrot.lane.b32.xlu1 %v174_v35, %s387_s13 }
 0x22e   :  { %v242_v49 = vpop.permute.xlu0 %241 }
 0x22f   :  { %v248_v50 = vsel %vm247_vm4, %v171_v30, %v242_v49 }
 0x230   :  { %251 = vst.msk [vmem:[#allocation2] sm:$0xff] %vm250_vm5, %v248_v50  ;;  %v244_v51 = vpop.permute.xlu1 %243 }
 0x231   :  { %v249_v52 = vsel %vm247_vm4, %v174_v35, %v244_v51 }
 0x232   :  { %252 = vst.msk [vmem:[#allocation2 + $0x8] sm:$0xff] %vm250_vm5, %v249_v52  ;;  %v254_v53 = vpop.permute.xlu0 %253 }
 0x233   :  { %259 = vst.msk [vmem:[#allocation4] sm:$0xff] %vm250_vm5, %v254_v53 }
 0x234   :  { %345 = shalt.err (!%p342_p4)
}
 0x235   :  { %s346_s20 = scalar_lea.hbm %s535_s9, 256 }
 0x236   :  { %p347_p5 = scmp.ne.s32.totalorder %s535_s9, %s346_s20  ;;  %p350_p6 = scmp.lt.u32.totalorder %s346_s20, %s535_s9 }
 0x238   :  { %p352_p7 = pnand %p350_p6, %p347_p5 }
 0x23a   :  { %355 = shalt.err (!%p352_p7)
}
 0x23b   :  { %s390_s23 = smov 128   ;;  %s391_s24 = smov 8   ;;  %v256_v54 = vpop.permute.xlu1 %255 }
 0x23c   :  { %272 = dma.vmem_to_hbm [thread:$0]  %s267_s15, 256, %s535_s9, [#allocation3], %s390_s23, %s390_s23, %s391_s24   ;;  %260 = vst.msk [vmem:[#allocation4 + $0x8] sm:$0xff] %vm250_vm5, %v256_v54 }
 0x23d   :  { %s356_s1 = scalar_lea.vmem %s493_s16, 256  ;;  %p361_p9 = scmp.lt.s32.totalorder %s493_s16, %s493_s16 }
 0x23e   :  { %p357_p8 = scmp.ne.s32.totalorder %s493_s16, %s356_s1  ;;  %p362_p10 = scmp.lt.s32.totalorder %s356_s1, %s356_s1 }
 0x240   :  { %p363_p11 = por %p362_p10, %p361_p9 }
 0x242   :  { %p364_p12 = pnand %p363_p11, %p357_p8 }
 0x244   :  { %367 = shalt.err (!%p364_p12)
}
 0x245   :  { %s368_s28 = scalar_lea.hbm %s536_s10, 256 }
 0x246   :  { %p369_p13 = scmp.ne.s32.totalorder %s536_s10, %s368_s28  ;;  %p372_p0 = scmp.lt.u32.totalorder %s368_s28, %s536_s10 }
 0x248   :  { %p374_p1 = pnand %p372_p0, %p369_p13 }
 0x24a   :  { %377 = shalt.err (!%p374_p1)
}
 0x24b   :  { %284 = dma.vmem_to_hbm [thread:$0]  %s493_s16, 256, %s536_s10, [#allocation5], %s390_s23, %s390_s23, %s391_s24  }
 0x24c   :  { %378 = dma.done.wait [#allocation3], 256  }
 0x24d   :  { %379 = vsyncadd [#allocation3], 4294967040 }
 0x24e   :  { %380 = dma.done.wait [#allocation5], 256  }
 0x24f   :  { %381 = vsyncadd [#allocation5], 4294967040 }
 0x250   :  { %291 = vsyncpa [#allocation3], 1 }
 0x251   :  { %292 = vsyncpa [#allocation5], 1 }

</bundles_post_ra>
